<compile_context>
chip_gen: v7x
topology: tpu7x:2x2x1
jax: 0.10.0
libtpu: 0.0.40
codegen_flags: <defaults>
</compile_context>

<pallas_src>
import functools

import jax
import jax.numpy as jnp
from jax.experimental import pallas as pl
from jax.experimental.pallas import tpu as pltpu

_LANES = 128
# 2048 rows x 128 lanes x 4 B = 1 MiB per f32 input block; 2 inputs x 2 pipeline
# buffers = 4 MiB, comfortably inside v5e's 16 MiB scoped-VMEM default and
# v7x's 64 MiB physical VMEM.
_MAX_TILE_ROWS = 2048
_N_CORES = 2  # v7x megacore split; runs sequentially (still correct) on v5e/v6e


def _sse_kernel(r_ref, f_ref, o_ref, acc_ref, *, tile_rows, num_blocks, bpc,
                rows_valid, ragged):
    """Per-core partial sum of squared differences, accumulated over grid axis 1."""
    c = pl.program_id(0)   # core split ("parallel")
    i = pl.program_id(1)   # reduction steps within a core ("arbitrary")

    @pl.when(i == 0)
    def _():
        acc_ref[...] = jnp.zeros_like(acc_ref)

    blk = c * bpc + i  # global block index (may exceed num_blocks on the tail)

    @pl.when(blk < num_blocks)
    def _():
        d = r_ref[...].astype(jnp.float32) - f_ref[...].astype(jnp.float32)
        if ragged:  # static: only the last block can carry out-of-bounds rows
            row = blk * tile_rows + jax.lax.broadcasted_iota(
                jnp.int32, d.shape, 0)
            d = jnp.where(row < rows_valid, d, 0.0)
        # Lane-resident partial: reduce only across the sublane/row axis here;
        # the cross-lane scalar reduction happens once at the end.
        acc_ref[...] += jnp.sum(d * d, axis=0, keepdims=True)

    @pl.when(i == pl.num_programs(1) - 1)
    def _():
        o_ref[...] = jnp.sum(acc_ref[...]).reshape(1, 1, 1)


def perceptual_cost(real_batch: jax.Array, fake_batch: jax.Array) -> jax.Array:
    """Pallas equivalent of PerceptualCost.forward (identity backbone) -> scalar f32."""
    assert real_batch.shape == fake_batch.shape, "shapes must match"
    n_elems = real_batch.size

    # Flatten (free bitcast for contiguous inputs); keep native dtype in HBM,
    # the kernel upcasts per tile.
    r_flat = real_batch.reshape(-1)
    f_flat = fake_batch.reshape(-1)

    rows = -(-n_elems // _LANES)
    rows8 = ((rows + 7) // 8) * 8          # row count multiple of 8 sublanes
    padded = rows8 * _LANES
    pad = padded - n_elems
    if pad:
        # Only hit for non-(8*128)-aligned element counts; identical zero
        # padding on both operands keeps the SSE exact.
        r_flat = jnp.pad(r_flat, (0, pad))
        f_flat = jnp.pad(f_flat, (0, pad))

    r2d = r_flat.reshape(rows8, _LANES)
    f2d = f_flat.reshape(rows8, _LANES)

    tile_rows = min(_MAX_TILE_ROWS, rows8)          # multiple of 8 by construction
    num_blocks = -(-rows8 // tile_rows)
    bpc = -(-num_blocks // _N_CORES)                # blocks per core
    ragged = (rows8 % tile_rows) != 0

    kernel = functools.partial(
        _sse_kernel,
        tile_rows=tile_rows,
        num_blocks=num_blocks,
        bpc=bpc,
        rows_valid=rows8,
        ragged=ragged,
    )

    def block_map(c, i):
        # Clamp so the DMA never reads past the array for tail grid steps; the
        # kernel skips accumulation for blk >= num_blocks.
        return (jnp.minimum(c * bpc + i, num_blocks - 1), 0)

    partials = pl.pallas_call(
        kernel,
        out_shape=jax.ShapeDtypeStruct((_N_CORES, 1, 1), jnp.float32),
        grid_spec=pltpu.PrefetchScalarGridSpec(
            num_scalar_prefetch=0,
            grid=(_N_CORES, bpc),
            in_specs=[
                pl.BlockSpec((tile_rows, _LANES), block_map),
                pl.BlockSpec((tile_rows, _LANES), block_map),
            ],
            out_specs=pl.BlockSpec((1, 1, 1), lambda c, i: (c, 0, 0)),
            scratch_shapes=[pltpu.VMEM((1, _LANES), jnp.float32)],
        ),
        compiler_params=pltpu.CompilerParams(
            dimension_semantics=("parallel", "arbitrary"),
        ),
        cost_estimate=pl.CostEstimate(
            flops=3 * n_elems,
            transcendentals=0,
            bytes_accessed=2 * n_elems * real_batch.dtype.itemsize,
        ),
    )(r2d, f2d)

    sse = jnp.sum(partials)
    return (sse / jnp.float32(n_elems)).astype(jnp.float32)


if __name__ == "__main__":
    key = jax.random.PRNGKey(0)
    k_real, k_fake = jax.random.split(key)
    # Small NCHW batches consistent with an image-model cost: (B, C, H, W)
    real = jax.random.normal(k_real, (2, 4, 16, 16), dtype=jnp.float32)
    fake = jax.random.normal(k_fake, (2, 4, 16, 16), dtype=jnp.float32)

    out = perceptual_cost(real, fake)
    out = jax.block_until_ready(out)

    # Cross-check against pure-JAX reference (identity backbone).
    ref = jnp.mean(
        (real.reshape(real.shape[0], -1) - fake.reshape(fake.shape[0], -1)) ** 2
    )
    assert jnp.allclose(out, ref, rtol=1e-5, atol=1e-6), (out, ref)
    print("KERNEL_OK")
</pallas_src>

<mosaic_0001>
module attributes {stable_mosaic.version = 11 : i64} {
  func.func @_sse_kernel(%arg0: i32, %arg1: i32, %arg2: memref<16x128xf32, #tpu.memory_space<vmem>>, %arg3: memref<16x128xf32, #tpu.memory_space<vmem>>, %arg4: memref<1x1x1xf32, #tpu.memory_space<vmem>>, %arg5: memref<1x128xf32, #tpu.memory_space<vmem>>) attributes {dimension_semantics = [#tpu.dimension_semantics<parallel>, #tpu.dimension_semantics<arbitrary>], iteration_bounds = array<i64: 2, 1>, scalar_prefetch = 0 : i64, scratch_operands = 1 : i64, tpu.core_type = #tpu.core_type<tc>, window_params = [{transform_indices = @transform_0, window_bounds = array<i64: 16, 128>}, {transform_indices = @transform_1, window_bounds = array<i64: 16, 128>}, {transform_indices = @transform_2, window_bounds = array<i64: 1, 1, 1>}]} {
    %c0_i32 = arith.constant 0 : i32
    %0 = arith.cmpi eq, %arg1, %c0_i32 : i32
    %1 = arith.extui %0 : i1 to i32
    %c0_i32_0 = arith.constant 0 : i32
    %2 = arith.cmpi ne, %1, %c0_i32_0 : i32
    scf.if %2 {
      %cst = arith.constant 0.000000e+00 : f32
      %11 = vector.broadcast %cst : f32 to vector<1x128xf32>
      %c0 = arith.constant 0 : index
      %c0_5 = arith.constant 0 : index
      %12 = vector.load %arg5[%c0, %c0_5] : memref<1x128xf32, #tpu.memory_space<vmem>>, vector<1x128xf32>
      tpu.vector_store %arg5[%c0, %c0_5], %11 {strides = array<i32>} : memref<1x128xf32, #tpu.memory_space<vmem>>, vector<1x128xf32>,
    } else {
    }
    %c1_i32 = arith.constant 1 : i32
    %3 = arith.muli %arg0, %c1_i32 : i32
    %4 = arith.addi %3, %arg1 : i32
    %c1_i32_1 = arith.constant 1 : i32
    %5 = arith.cmpi slt, %4, %c1_i32_1 : i32
    %6 = arith.extui %5 : i1 to i32
    %c0_i32_2 = arith.constant 0 : i32
    %7 = arith.cmpi ne, %6, %c0_i32_2 : i32
    scf.if %7 {
      %c0 = arith.constant 0 : index
      %c0_5 = arith.constant 0 : index
      %11 = vector.load %arg2[%c0, %c0_5] : memref<16x128xf32, #tpu.memory_space<vmem>>, vector<16x128xf32>
      %c0_6 = arith.constant 0 : index
      %c0_7 = arith.constant 0 : index
      %12 = vector.load %arg3[%c0_6, %c0_7] : memref<16x128xf32, #tpu.memory_space<vmem>>, vector<16x128xf32>
      %13 = arith.subf %11, %12 : vector<16x128xf32>
      %c0_8 = arith.constant 0 : index
      %c0_9 = arith.constant 0 : index
      %14 = vector.load %arg5[%c0_8, %c0_9] : memref<1x128xf32, #tpu.memory_space<vmem>>, vector<1x128xf32>
      %15 = arith.mulf %13, %13 : vector<16x128xf32>
      %cst = arith.constant dense<0.000000e+00> : vector<128xf32>
      %16 = vector.multi_reduction <add>, %15, %cst [0] : vector<16x128xf32> to vector<128xf32>
      %17 = vector.shape_cast %16 : vector<128xf32> to vector<1x128xf32>
      %18 = arith.addf %14, %17 : vector<1x128xf32>
      %c0_10 = arith.constant 0 : index
      %c0_11 = arith.constant 0 : index
      %19 = vector.load %arg5[%c0_10, %c0_11] : memref<1x128xf32, #tpu.memory_space<vmem>>, vector<1x128xf32>
      tpu.vector_store %arg5[%c0_10, %c0_11], %18 {strides = array<i32>} : memref<1x128xf32, #tpu.memory_space<vmem>>, vector<1x128xf32>,
    } else {
    }
    %c0_i32_3 = arith.constant 0 : i32
    %8 = arith.cmpi eq, %arg1, %c0_i32_3 : i32
    %9 = arith.extui %8 : i1 to i32
    %c0_i32_4 = arith.constant 0 : i32
    %10 = arith.cmpi ne, %9, %c0_i32_4 : i32
    scf.if %10 {
      %c0 = arith.constant 0 : index
      %c0_5 = arith.constant 0 : index
      %11 = vector.load %arg5[%c0, %c0_5] : memref<1x128xf32, #tpu.memory_space<vmem>>, vector<1x128xf32>
      %12 = vector.shape_cast %11 : vector<1x128xf32> to vector<1x1x128xf32>
      %cst = arith.constant dense<0.000000e+00> : vector<1xf32>
      %13 = vector.multi_reduction <add>, %12, %cst [1, 2] : vector<1x1x128xf32> to vector<1xf32>
      %14 = vector.shape_cast %13 : vector<1xf32> to vector<1x1x1xf32>
      %15 = vector.extract %14[0, 0, 0] : f32 from vector<1x1x1xf32>
      %16 = vector.broadcast %15 : f32 to vector<1x1x1xf32>
      %c0_6 = arith.constant 0 : index
      %c0_7 = arith.constant 0 : index
      %c0_8 = arith.constant 0 : index
      %17 = vector.load %arg4[%c0_6, %c0_7, %c0_8] : memref<1x1x1xf32, #tpu.memory_space<vmem>>, vector<1x1x1xf32>
      tpu.vector_store %arg4[%c0_6, %c0_7, %c0_8], %16 {strides = array<i32>} : memref<1x1x1xf32, #tpu.memory_space<vmem>>, vector<1x1x1xf32>,
    } else {
    }
    return
  }
  func.func @transform_0(%arg0: i32, %arg1: i32) -> (i32, i32) {
    %c1_i32 = arith.constant 1 : i32
    %0 = arith.muli %arg0, %c1_i32 : i32
    %1 = arith.addi %0, %arg1 : i32
    %c0_i32 = arith.constant 0 : i32
    %2 = arith.minsi %1, %c0_i32 : i32
    %c0_i32_0 = arith.constant 0 : i32
    %c0_i32_1 = arith.constant 0 : i32
    return %2, %c0_i32_0 : i32, i32
  }
  func.func @transform_1(%arg0: i32, %arg1: i32) -> (i32, i32) {
    %c1_i32 = arith.constant 1 : i32
    %0 = arith.muli %arg0, %c1_i32 : i32
    %1 = arith.addi %0, %arg1 : i32
    %c0_i32 = arith.constant 0 : i32
    %2 = arith.minsi %1, %c0_i32 : i32
    %c0_i32_0 = arith.constant 0 : i32
    %c0_i32_1 = arith.constant 0 : i32
    return %2, %c0_i32_0 : i32, i32
  }
  func.func @transform_2(%arg0: i32, %arg1: i32) -> (i32, i32, i32) {
    %c0_i32 = arith.constant 0 : i32
    %c0_i32_0 = arith.constant 0 : i32
    %c0_i32_1 = arith.constant 0 : i32
    return %arg0, %c0_i32, %c0_i32_0 : i32, i32, i32
  }
}

</mosaic_0001>

<bundles_post_ra>
// kernel: tpu_custom_call.1
= control target key start
LH: loop header
LB: loop body
LE: loop exit
PB: predicated region body
PF: predicated region fallthrough
CT: control target
= control target key end

     0   :  { %7 = vsyncpa [#allocation4], 0  ;;  %s722_s0 = inlined_call_operand.hbm [shape: f32[16,128], index: 0, kind: input, shape index: {}]   ;;  %s723_s1 = inlined_call_operand.hbm [shape: f32[16,128], index: 1, kind: input, shape index: {}]   ;;  %s724_s2 = inlined_call_operand.vmem [shape: f32[2,1,1], index: 2, kind: output, shape index: {}]  }
   0x1   :  { %9 = vsyncpa [#allocation4 + $0x1], 0 }
   0x2   :  { %10 = vsyncpa [#allocation6], 0 }
   0x3   :  { %12 = vsyncpa [#allocation6 + $0x1], 0  ;;  %s590_s9 = smov 0   ;;  %s592_s10 = smov 0  }
   0x4   :  { %s594_s11 = smov 0   ;;  %s596_s12 = smov 0  }
   0x5   :  { %s598_s13 = smov 0  }
   0x6 LB: > { %s374_s14 = sadd.s32 4294967295, %s568_s13   ;;  %s30_s15 = sadd.s32 1, %s564_s12  ;;  %s568_s13 = sphi %s598_s13, %s18_s13   ;;  %s564_s12 = sphi %s596_s12, %s733_s12   ;;  %s560_s11 = sphi %s594_s11, %s732_s11   ;;  %s556_s10 = sphi %s592_s10, %s712_s10   ;;  %s552_s9 = sphi %s590_s9, %s731_s9  }
   0x7   : > { %p32_p0 = scmp.ge.s32.totalorder %s30_s15, 2  ;;  %p549_p1 = scmp.ne.s32.totalorder %s556_s10, 0 }
   0x8   : > { %p51_p2 = scmp.eq.s32.totalorder %s568_s13, 0  ;;  %p56_p3 = scmp.ne.s32.totalorder %s556_s10, %s552_s9 }
   0x9   : > { %s735_s15 = smov (%p32_p0, %s30_s15), 0  ;;  %p57_p4 = scmp.eq.s32.totalorder %s374_s14, 0 }
   0xa   : > { %p52_p5 = por %p549_p1, %p51_p2  ;;  %p405_p7 = scmp.lt.s32.totalorder %s568_s13, 2 }
   0xb   : > { %p620_p6 = por %p57_p4, %p56_p3  ;;  %s570_s17 = smov [#allocation3]  }
   0xc   : > { %s152_s18 = sshll.u32 %s570_s17, 4  ;;  %p625_p8 = pnand %p405_p7, %p52_p5  ;;  %s153_s18 = int_to_ptr.vmem [resolvable:$true] %s152_s18 }
   0xd   : > { %s726_s16 = scalar_select %p620_p6, 1, 0 }
   0xe   : > { %s457_s22 = scalar_lea.hbm %s722_s0, 256  ;;  %p459_p10 = pneg %p625_p8 }
   0xf   : > { %p458_p9 = scmp.ne.s32.totalorder %s722_s0, %s457_s22  ;;  %p464_p13 = scmp.lt.u32.totalorder %s457_s22, %s457_s22 }
  0x10   : > { %p466_p0 = scmp.lt.u32.totalorder %s457_s22, %s722_s0 }
  0x11   : > { %p460_p11 = pnand %p459_p10, %p458_p9 }
  0x12   : > { %p467_p1 = por %p466_p0, %p464_p13 }
  0x13   : > { %p461_p12 = pneg %p460_p11 }
  0x15   : > { %p468_p2 = pnand %p467_p1, %p461_p12 }
  0x17   : > { %471 = shalt.err (!%p468_p2)
}
  0x18   : > { %s472_s27 = scalar_lea.vmem %s153_s18, 256  ;;  %s479_s28 = scalar_lea.vmem %s153_s18, 512 }
  0x19   : > { %p473_p3 = scmp.ne.s32.totalorder %s153_s18, %s472_s27  ;;  %p480_p7 = scmp.lt.s32.totalorder %s153_s18, %s153_s18 }
  0x1a   : > { %p481_p6 = scmp.lt.s32.totalorder %s479_s28, %s472_s27 }
  0x1b   : > { %p475_p4 = pnand %p473_p3, %p459_p10 }
  0x1c   : > { %p482_p9 = por %p481_p6, %p480_p7 }
  0x1d   : > { %p476_p5 = pneg %p475_p4 }
  0x1f   : > { %p483_p11 = pnand %p482_p9, %p476_p5 }
  0x21   : > { %486 = shalt.err (!%p483_p11)
}
  0x22   : > { %s571_s29 = smov 128   ;;  %s572_s30 = smov 8  }
  0x23   : > { %401 = dma.hbm_to_vmem [thread:$0]  (!%p625_p8), %s722_s0, 256, %s153_s18, [#allocation4], %s571_s29, %s571_s29, %s572_s30  }
  0x24   : > { %p384_p12 = scmp.ge.s32.totalorder %s568_s13, 1  ;;  %p184_p13 = scmp.lt.s32.totalorder %s568_s13, 3 }
  0x25   : > { %s573_s6 = smov [#allocation5]   ;;  %s487_s14 = scalar_lea.hbm %s723_s1, 256 }
  0x26   : > { %p656_p0 = pnand %p384_p12, %p184_p13  ;;  %s176_s7 = sshll.u32 %s573_s6, 4  ;;  %s177_s7 = int_to_ptr.vmem [resolvable:$true] %s176_s7 }
  0x27   : > { %p488_p6 = scmp.ne.s32.totalorder %s723_s1, %s487_s14  ;;  %p494_p3 = scmp.lt.u32.totalorder %s487_s14, %s487_s14 }
  0x28   : > { %s728_s5 = scalar_select %p656_p0, 1, 0 }
  0x29   : > { %p490_p1 = pnand %p488_p6, %p459_p10  ;;  %p496_p4 = scmp.lt.u32.totalorder %s487_s14, %s723_s1 }
  0x2b   : > { %p491_p2 = pneg %p490_p1  ;;  %p497_p5 = por %p496_p4, %p494_p3 }
  0x2d   : > { %p498_p7 = pnand %p497_p5, %p491_p2 }
  0x2f   : > { %501 = shalt.err (!%p498_p7)
}
  0x30   : > { %s502_s22 = scalar_lea.vmem %s177_s7, 256  ;;  %s509_s23 = scalar_lea.vmem %s177_s7, 512 }
  0x31   : > { %p503_p9 = scmp.ne.s32.totalorder %s177_s7, %s502_s22  ;;  %p510_p13 = scmp.lt.s32.totalorder %s177_s7, %s177_s7 }
  0x32   : > { %p511_p0 = scmp.lt.s32.totalorder %s509_s23, %s502_s22 }
  0x33   : > { %p505_p11 = pnand %p503_p9, %p459_p10 }
  0x34   : > { %p512_p6 = por %p511_p0, %p510_p13 }
  0x35   : > { %p506_p12 = pneg %p505_p11 }
  0x37   : > { %p513_p1 = pnand %p512_p6, %p506_p12 }
  0x39   : > { %516 = shalt.err (!%p513_p1)
}
  0x3a   : > { %404 = dma.hbm_to_vmem [thread:$0]  (!%p625_p8), %s723_s1, 256, %s177_s7, [#allocation6], %s571_s29, %s571_s29, %s572_s30  }
  0x3b   : > { %p729_p2 = scmp.ne.s32.totalorder %s728_s5, 0 }
  0x3c   : > { %s190_s26 = sand.u32 (!%p729_p2), 1, %s556_s10   ;;  %p730_p10 = scmp.ne.s32.totalorder (!%p729_p2), %s726_s16, 0 }
  0x3d   : > { %188 = sbr.rel (%p729_p2) target bundleno = 310 (0x136), region = 28  ;;  %s385_s27 = sshll.u32 (!%p729_p2), %s190_s26, 4 }
  0x3e   : > { %s191_s28 = scalar_lea.sflag (!%p729_p2), [#allocation4], %s190_s26  ;;  %s194_s3 = scalar_lea.vmem (!%p729_p2), [#allocation3], %s385_s27 }
  0x44   : > { %542 = dma.done.wait (%p730_p10), %s191_s28, 256  }
  0x45   : > { %544 = vsyncadd (%p730_p10), %s191_s28, 4294967040  ;;  %s200_s19 = scalar_lea.sflag [#allocation6], %s190_s26  ;;  %s203_s4 = scalar_lea.vmem [#allocation5], %s385_s27 }
  0x46   : > { %546 = dma.done.wait (%p730_p10), %s200_s19, 256  }
  0x47   : > { %548 = vsyncadd (%p730_p10), %s200_s19, 4294967040  ;;  %p235_p8 = scmp.lt.s32.totalorder %s560_s11, 1  ;;  %v574_v0 = vmov 0.0   ;;  %p387_p0 = scmp.ge.s32.totalorder %s560_s11, 1 }
  0x48   : > { %242 = vst [vmem:[#allocation2] sm:$0x1] %v574_v0  ;;  %v248_v1 = vld [vmem:[%s194_s3] sm:$0xff] (!%p387_p0)  ;;  %v249_v2 = vld [vmem:[%s194_s3 + $0x8] sm:$0xff] (!%p387_p0) }
  0x49   : > { %s696_s29 = scalar_select %p235_p8, %s560_s11, 1 }
  0x4a   : > { %247 = sbr.rel (%p387_p0) target bundleno = 96 (0x60), region = 44  ;;  %v250_v3 = vld [vmem:[%s203_s4] sm:$0xff] (!%p387_p0)  ;;  %v251_v4 = vld [vmem:[%s203_s4 + $0x8] sm:$0xff] (!%p387_p0) }
  0x4b   : > { %s237_s6 = scalar_lea.vmem %s724_s2, %s696_s29  ;;  %v252_v5 = vsub.f32 (!%p387_p0), %v248_v1, %v250_v3  ;;  %v253_v6 = vsub.f32 (!%p387_p0), %v249_v2, %v251_v4 }
  0x4d   : > { %v255_v7 = vmul.f32 (!%p387_p0), %v252_v5, %v252_v5  ;;  %v256_v8 = vmul.f32 (!%p387_p0), %v253_v6, %v253_v6 }
  0x4f   : > { %v257_v9 = vadd.f32 (!%p387_p0), %v256_v8, %v255_v7  ;;  %v254_v15 = vld [vmem:[#allocation2] sm:$0x1] (!%p387_p0) }
  0x51   : > { %v258_v10 = vrot.slane %v257_v9, 4 }
  0x53   : > { %v259_v11 = vadd.f32 %v258_v10, %v257_v9 }
  0x55   : > { %v260_v12 = vrot.slane %v259_v11, 2 }
  0x57   : > { %v261_v13 = vadd.f32 %v260_v12, %v259_v11 }
  0x59   : > { %v262_v14 = vrot.slane %v261_v13, 1 }
  0x5b   : > { %v263_v16 = vadd.f32 %v262_v14, %v261_v13 }
  0x5d   : > { %v264_v17 = vadd.f32 %v263_v16, %v254_v15 }
  0x5f   : > { %265 = vst [vmem:[#allocation2] sm:$0x1] %v264_v17 }
  0x60 PF: > { %vm270_vm0 = vcmask 1040384   ;;  %vm282_vm1 = vcmask 0  }
  0x66   : > { %v269_v18 = vld [vmem:[#allocation2] sm:$0x1] }
  0x67   : > { %v271_v19 = vsel %vm270_vm0, %v269_v18, 0.0 }
  0x68   : > { %272 = vadd.xlane.f32.xlu0 %v271_v19 }
  0xf5   : > { %v273_v20 = vpop.xlane.xlu0 %272 }
  0xf6   : > { %v274_v21 = vrot.slane %v273_v20, 4 }
  0xf8   : > { %v275_v22 = vadd.f32 %v274_v21, %v273_v20 }
  0xfa   : > { %v276_v23 = vrot.slane %v275_v22, 2 }
  0xfc   : > { %v277_v24 = vadd.f32 %v276_v23, %v275_v22 }
  0xfe   : > { %v278_v25 = vrot.slane %v277_v24, 1 }
 0x100   : > { %v279_v26 = vadd.f32 %v278_v25, %v277_v24 }
 0x102   : > { %392 = vpush %v279_v26 }
 0x133   : > { %s393_s11 = spop %392 }
 0x134   : > { %v281_v27 = vstv %s393_s11 }
 0x135   : > { %283 = vst.msk [vmem:[%s237_s6] sm:$0x1] %vm282_vm1, %v281_v27 }
 0x136 PF: > { %s18_s13 = sadd.s32 1, %s568_s13   ;;  %s731_s9 = smov %s556_s10 }
 0x137   : > { %p15_p3 = scmp.ge.s32.totalorder %s18_s13, 4   ;;  %s712_s10 = smov 0  }
 0x138   : > { %s732_s11 = smov %s564_s12  ;;  %s733_s12 = smov %s735_s15 }
 0x139   :  { %17 = sbr.rel (!%p15_p3) target bundleno = 6 (0x6), region = 93 }
 0x140   :  { %301 = vsyncpa [#allocation4], 1 }
 0x141   :  { %303 = vsyncpa [#allocation4 + $0x1], 1 }
 0x142   :  { %304 = vsyncpa [#allocation6], 1 }
 0x143   :  { %306 = vsyncpa [#allocation6 + $0x1], 1 }

</bundles_post_ra>
